<compile_context>
chip_gen: v5e
topology: v5e:2x2
jax: 0.10.0
libtpu: 0.0.40
codegen_flags: <defaults>
</compile_context>

<pallas_src>
import functools
import math

import jax
import jax.numpy as jnp
from jax.experimental import pallas as pl
from jax.experimental.pallas import tpu as pltpu


def _projection_kernel(x_ref, cmb_ref, out_ref, acc_ref, *, n_nodes,
                       out_features):
    # x_ref:   (1, C, T)      activation tile, spatial on the lane axis
    # cmb_ref: (F + N, C)     fused [weight | feature_to_graph_matrix]^T
    # out_ref: (1, N, F)      graph output for this batch element
    # acc_ref: (N, F) f32     accumulator across HW tiles
    hw = pl.program_id(1)

    @pl.when(hw == 0)
    def _():
        acc_ref[...] = jnp.zeros_like(acc_ref)

    x = x_ref[0]                                                   # (C, T)

    # One fused projection for both operands: (F+N, C) @ (C, T) -> (F+N, T).
    proj_t = jnp.dot(cmb_ref[...], x,
                     preferred_element_type=jnp.float32)           # (F+N, T)
    wg_t = proj_t[:out_features, :]                                # (F, T)
    fg_t = proj_t[out_features:, :]                                # (N, T)

    # Softmax over the node axis (axis 0) -- each spatial column independent,
    # so HW tiling does not interact with the softmax.
    m = jnp.max(fg_t, axis=0, keepdims=True)                       # (1, T)
    e = jnp.exp(fg_t - m)                                          # (N, T)
    s = jnp.sum(e, axis=0, keepdims=True)                          # (1, T)
    sm = e * pl.reciprocal(s, approx=True)                         # (N, T)

    # graph partial = softmax(XM)^T @ (XW): contract the spatial (lane) axis
    # of both operands directly -- no explicit transpose materialized.
    acc_ref[...] += jax.lax.dot_general(
        sm, wg_t,
        dimension_numbers=(((1,), (1,)), ((), ())),
        preferred_element_type=jnp.float32)                        # (N, F)

    @pl.when(hw == pl.num_programs(1) - 1)
    def _():
        out_ref[0] = jnp.maximum(acc_ref[...], 0.0).astype(out_ref.dtype)


def _pick_hw_tile(hw, cap=1024):
    """Largest lane-aligned divisor of HW up to `cap` (keeps VMEM modest)."""
    if hw % 128 != 0:
        return hw                       # block must equal the full extent
    best = 128
    t = 128
    while t <= min(hw, cap):
        if hw % t == 0:
            best = t
        t += 128
    return best


def feature_map_to_graph_projection(x_nchw, feature_to_graph_matrix, weight):
    """x_nchw: (B, C, H, W) float32.  Returns (B, n_nodes, out_features)."""
    B, C, H, W = x_nchw.shape
    HW = H * W
    n_nodes = feature_to_graph_matrix.shape[1]
    out_features = weight.shape[1]

    # Free reshape only -- no HBM transpose of the activation.
    x = x_nchw.reshape(B, C, HW)

    # Fuse the two projections; pre-transpose the tiny parameter so the kernel
    # matmul is the canonical (M, K) @ (K, N) form.  wg rows first so both
    # sublane slices in-kernel start at multiples of 8 (F % 8 == 0).
    cmb_t = jnp.concatenate([weight, feature_to_graph_matrix], axis=1).T
    cmb_t = cmb_t.astype(jnp.float32)                              # (F+N, C)

    t_hw = _pick_hw_tile(HW)
    grid = (B, HW // t_hw)

    kernel = functools.partial(_projection_kernel,
                               n_nodes=n_nodes, out_features=out_features)

    flops = (2 * B * HW * C * (n_nodes + out_features)
             + 2 * B * HW * n_nodes * out_features)
    bytes_accessed = 4 * (B * C * HW + (n_nodes + out_features) * C
                          + B * n_nodes * out_features)
    cost = pl.CostEstimate(flops=int(flops),
                           transcendentals=int(B * HW * n_nodes),
                           bytes_accessed=int(bytes_accessed))

    return pl.pallas_call(
        kernel,
        out_shape=jax.ShapeDtypeStruct((B, n_nodes, out_features),
                                       jnp.float32),
        grid_spec=pltpu.PrefetchScalarGridSpec(
            num_scalar_prefetch=0,
            grid=grid,
            in_specs=[
                pl.BlockSpec((1, C, t_hw), lambda b, h: (b, 0, h)),
                pl.BlockSpec((out_features + n_nodes, C),
                             lambda b, h: (0, 0)),
            ],
            out_specs=pl.BlockSpec((1, n_nodes, out_features),
                                   lambda b, h: (b, 0, 0)),
            scratch_shapes=[pltpu.VMEM((n_nodes, out_features), jnp.float32)],
        ),
        compiler_params=pltpu.CompilerParams(
            dimension_semantics=("parallel", "arbitrary")),
        cost_estimate=cost,
    )(x, cmb_t)


def _xavier_uniform(key, shape, dtype=jnp.float32):
    fan_in, fan_out = shape
    bound = math.sqrt(6.0 / (fan_in + fan_out))
    return jax.random.uniform(key, shape, dtype, minval=-bound, maxval=bound)


def _reference(x_nchw, fm, w):
    B, C, H, W = x_nchw.shape
    x = jnp.transpose(x_nchw.reshape(B, C, H * W), (0, 2, 1))
    fg = jnp.einsum("bsc,cn->bsn", x, fm, precision="highest")
    wg = jnp.einsum("bsc,cf->bsf", x, w, precision="highest")
    fg = jax.nn.softmax(fg, axis=-1)
    return jax.nn.relu(jnp.einsum("bsn,bsf->bnf", fg, wg,
                                  precision="highest"))


if __name__ == "__main__":
    # Small shapes consistent with the module's forward.
    B, C, H, W = 2, 4, 16, 16          # in_features = C = 4
    n_nodes, out_features = 8, 32

    key = jax.random.PRNGKey(0)
    kx, kfm, kw = jax.random.split(key, 3)

    x = jax.random.normal(kx, (B, C, H, W), jnp.float32)
    feature_to_graph_matrix = _xavier_uniform(kfm, (C, n_nodes))
    weight = _xavier_uniform(kw, (C, out_features))

    out = feature_map_to_graph_projection(x, feature_to_graph_matrix, weight)
    out = jax.block_until_ready(out)

    ref = _reference(x, feature_to_graph_matrix, weight)
    assert out.shape == (B, n_nodes, out_features)
    # Tolerance slightly loosened vs exact f32: the softmax normalization uses
    # the EUP approximate reciprocal (pl.reciprocal(..., approx=True)).
    assert jnp.allclose(out, ref, atol=5e-3, rtol=5e-3)

    print("KERNEL_OK")
</pallas_src>

<mosaic_0001>
module attributes {stable_mosaic.version = 11 : i64} {
  func.func @_projection_kernel(%arg0: i32, %arg1: i32, %arg2: memref<1x4x256xf32, #tpu.memory_space<vmem>>, %arg3: memref<40x4xf32, #tpu.memory_space<vmem>>, %arg4: memref<1x8x32xf32, #tpu.memory_space<vmem>>, %arg5: memref<8x32xf32, #tpu.memory_space<vmem>>) attributes {dimension_semantics = [#tpu.dimension_semantics<parallel>, #tpu.dimension_semantics<arbitrary>], iteration_bounds = array<i64: 2, 1>, scalar_prefetch = 0 : i64, scratch_operands = 1 : i64, tpu.core_type = #tpu.core_type<tc>, window_params = [{transform_indices = @transform_0, window_bounds = array<i64: 1, 4, 256>}, {pipeline_mode = #tpu.pipeline_mode<synchronous>, transform_indices = @transform_1, window_bounds = array<i64: 40, 4>}, {transform_indices = @transform_2, window_bounds = array<i64: 1, 8, 32>}]} {
    %c0_i32 = arith.constant 0 : i32
    %0 = arith.cmpi eq, %arg1, %c0_i32 : i32
    %1 = arith.extui %0 : i1 to i32
    %c0_i32_0 = arith.constant 0 : i32
    %2 = arith.cmpi ne, %1, %c0_i32_0 : i32
    scf.if %2 {
      %cst_14 = arith.constant 0.000000e+00 : f32
      %26 = vector.broadcast %cst_14 : f32 to vector<8x32xf32>
      %c0_15 = arith.constant 0 : index
      %c0_16 = arith.constant 0 : index
      %27 = vector.load %arg5[%c0_15, %c0_16] : memref<8x32xf32, #tpu.memory_space<vmem>>, vector<8x32xf32>
      tpu.vector_store %arg5[%c0_15, %c0_16], %26 {strides = array<i32>} : memref<8x32xf32, #tpu.memory_space<vmem>>, vector<8x32xf32>,
    } else {
    }
    %c0 = arith.constant 0 : index
    %c0_1 = arith.constant 0 : index
    %c0_2 = arith.constant 0 : index
    %3 = vector.load %arg2[%c0, %c0_1, %c0_2] : memref<1x4x256xf32, #tpu.memory_space<vmem>>, vector<1x4x256xf32>
    %4 = vector.shape_cast %3 : vector<1x4x256xf32> to vector<4x256xf32>
    %c0_3 = arith.constant 0 : index
    %c0_4 = arith.constant 0 : index
    %5 = vector.load %arg3[%c0_3, %c0_4] : memref<40x4xf32, #tpu.memory_space<vmem>>, vector<40x4xf32>
    %cst = arith.constant dense<0.000000e+00> : vector<40x256xf32>
    %6 = tpu.matmul %5, %4, %cst {dimension_numbers = #tpu.dot_dimension_numbers<[1], [0], [0], [1], [0, 0, 1, 1], [], []>} : vector<40x4xf32>, vector<4x256xf32>, vector<40x256xf32> -> vector<40x256xf32>
    %7 = vector.extract_strided_slice %6 {offsets = [0, 0], sizes = [32, 256], strides = [1, 1]} : vector<40x256xf32> to vector<32x256xf32>
    %8 = vector.extract_strided_slice %6 {offsets = [32, 0], sizes = [8, 256], strides = [1, 1]} : vector<40x256xf32> to vector<8x256xf32>
    %cst_5 = arith.constant dense<0xFF800000> : vector<256xf32>
    %9 = vector.multi_reduction <maximumf>, %8, %cst_5 [0] : vector<8x256xf32> to vector<256xf32>
    %10 = vector.shape_cast %9 : vector<256xf32> to vector<1x256xf32>
    %11 = vector.broadcast %10 : vector<1x256xf32> to vector<8x256xf32>
    %12 = arith.subf %8, %11 : vector<8x256xf32>
    %13 = math.exp %12 : vector<8x256xf32>
    %cst_6 = arith.constant dense<0.000000e+00> : vector<256xf32>
    %14 = vector.multi_reduction <add>, %13, %cst_6 [0] : vector<8x256xf32> to vector<256xf32>
    %15 = vector.shape_cast %14 : vector<256xf32> to vector<1x256xf32>
    %16 = tpu.reciprocal %15 {approx = true} : vector<1x256xf32> -> vector<1x256xf32>
    %17 = vector.broadcast %16 : vector<1x256xf32> to vector<8x256xf32>
    %18 = arith.mulf %13, %17 : vector<8x256xf32>
    %c0_7 = arith.constant 0 : index
    %c0_8 = arith.constant 0 : index
    %19 = vector.load %arg5[%c0_7, %c0_8] : memref<8x32xf32, #tpu.memory_space<vmem>>, vector<8x32xf32>
    %cst_9 = arith.constant dense<0.000000e+00> : vector<8x32xf32>
    %20 = tpu.matmul %18, %7, %cst_9 {dimension_numbers = #tpu.dot_dimension_numbers<[1], [1], [0], [0], [0, 0, 1, 0], [], []>} : vector<8x256xf32>, vector<32x256xf32>, vector<8x32xf32> -> vector<8x32xf32>
    %21 = arith.addf %19, %20 : vector<8x32xf32>
    %c0_10 = arith.constant 0 : index
    %c0_11 = arith.constant 0 : index
    %22 = vector.load %arg5[%c0_10, %c0_11] : memref<8x32xf32, #tpu.memory_space<vmem>>, vector<8x32xf32>
    tpu.vector_store %arg5[%c0_10, %c0_11], %21 {strides = array<i32>} : memref<8x32xf32, #tpu.memory_space<vmem>>, vector<8x32xf32>,
    %c0_i32_12 = arith.constant 0 : i32
    %23 = arith.cmpi eq, %arg1, %c0_i32_12 : i32
    %24 = arith.extui %23 : i1 to i32
    %c0_i32_13 = arith.constant 0 : i32
    %25 = arith.cmpi ne, %24, %c0_i32_13 : i32
    scf.if %25 {
      %c0_14 = arith.constant 0 : index
      %c0_15 = arith.constant 0 : index
      %26 = vector.load %arg5[%c0_14, %c0_15] : memref<8x32xf32, #tpu.memory_space<vmem>>, vector<8x32xf32>
      %cst_16 = arith.constant 0.000000e+00 : f32
      %27 = vector.broadcast %cst_16 : f32 to vector<8x32xf32>
      %28 = arith.maximumf %26, %27 : vector<8x32xf32>
      %c0_17 = arith.constant 0 : index
      %c0_18 = arith.constant 0 : index
      %c0_19 = arith.constant 0 : index
      %29 = vector.load %arg4[%c0_17, %c0_18, %c0_19] : memref<1x8x32xf32, #tpu.memory_space<vmem>>, vector<1x8x32xf32>
      %30 = vector.shape_cast %29 : vector<1x8x32xf32> to vector<8x32xf32>
      %31 = vector.shape_cast %28 : vector<8x32xf32> to vector<1x8x32xf32>
      tpu.vector_store %arg4[%c0_17, %c0_18, %c0_19], %31 {strides = array<i32>} : memref<1x8x32xf32, #tpu.memory_space<vmem>>, vector<1x8x32xf32>,
    } else {
    }
    return
  }
  func.func @transform_0(%arg0: i32, %arg1: i32) -> (i32, i32, i32) {
    %c0_i32 = arith.constant 0 : i32
    %c0_i32_0 = arith.constant 0 : i32
    return %arg0, %c0_i32, %arg1 : i32, i32, i32
  }
  func.func @transform_1(%arg0: i32, %arg1: i32) -> (i32, i32) {
    %c0_i32 = arith.constant 0 : i32
    %c0_i32_0 = arith.constant 0 : i32
    %c0_i32_1 = arith.constant 0 : i32
    return %c0_i32, %c0_i32_0 : i32, i32
  }
  func.func @transform_2(%arg0: i32, %arg1: i32) -> (i32, i32, i32) {
    %c0_i32 = arith.constant 0 : i32
    %c0_i32_0 = arith.constant 0 : i32
    %c0_i32_1 = arith.constant 0 : i32
    return %arg0, %c0_i32, %c0_i32_0 : i32, i32, i32
  }
}

</mosaic_0001>

<bundles_post_ra>
// kernel: tpu_custom_call.1
= control target key start
LH: loop header
LB: loop body
LE: loop exit
PB: predicated region body
PF: predicated region fallthrough
CT: control target
= control target key end

     0   :  { %7 = vsyncpa [#allocation4], 0  ;;  %s754_s0 = inlined_call_operand.vmem [shape: f32[2,4,256], index: 0, kind: input, shape index: {}]   ;;  %s755_s1 = inlined_call_operand.vmem [shape: f32[40,4], index: 1, kind: input, shape index: {}]   ;;  %s756_s2 = inlined_call_operand.hbm [shape: f32[2,8,32], index: 2, kind: output, shape index: {}]  }
   0x1   :  { %9 = vsyncpa [#allocation4 + $0x1], 0  ;;  %s629_s9 = smov 0   ;;  %s631_s10 = smov 0  }
   0x2   :  { %s633_s11 = smov 0   ;;  %s635_s12 = smov 0  }
   0x3   :  { %s637_s13 = smov 0   ;;  %s639_s14 = smov 0  }
   0x4 LB: > { %s444_s15 = sadd.s32 4294967295, %s611_s14   ;;  %s445_s16 = sadd.s32 4294967294, %s611_s14   ;;  %s611_s14 = sphi %s639_s14, %s15_s14   ;;  %s607_s13 = sphi %s637_s13, %s763_s13   ;;  %s603_s12 = sphi %s635_s12, %s762_s12   ;;  %s599_s11 = sphi %s633_s11, %s761_s11   ;;  %s595_s10 = sphi %s631_s10, %s760_s10   ;;  %s591_s9 = sphi %s629_s9, %s759_s9  }
   0x5   : > { %s27_s17 = sadd.s32 1, %s607_s13  ;;  %s83_s18 = sadd.s32 1, %s599_s11 }
   0x6   : > { %p29_p0 = scmp.ge.s32.totalorder %s27_s17, 2  ;;  %p93_p1 = scmp.ne.s32.totalorder %s599_s11, %s595_s10 }
   0x7   : > { %p94_p2 = scmp.eq.s32.totalorder %s444_s15, 1  ;;  %p99_p3 = scmp.ne.s32.totalorder %s595_s10, %s591_s9 }
   0x8   : > { %s765_s17 = smov (%p29_p0, %s27_s17), 0  ;;  %p100_p5 = scmp.eq.s32.totalorder %s445_s16, 1 }
   0x9   : > { %p669_p4 = por %p94_p2, %p93_p1  ;;  %s80_s20 = ssub.s32 %s607_s13, %s765_s17 }
   0xa   : > { %p448_p6 = scmp.ge.s32.totalorder %s611_s14, 1  ;;  %p81_p7 = scmp.eq.s32.totalorder %s80_s20, 0 }
   0xb   : > { %p676_p8 = por %p100_p5, %p99_p3  ;;  %p134_p9 = scmp.lt.s32.totalorder %s611_s14, 3 }
   0xc   : > { %s682_s22 = scalar_select %p81_p7, %s599_s11, %s83_s18  }
   0xd   : > { %p135_p10 = pnand %p448_p6, %p134_p9 }
   0xe   : > { %p161_p11 = scmp.lt.s32.totalorder (!%p135_p10), %s603_s12, 1  ;;  %s157_s16 = sand.u32 (!%p135_p10), 1, %s595_s10  }
   0xf   : > { %138 = sbr.rel (%p135_p10) target bundleno = 386 (0x182), region = 28  ;;  %s449_s18 = sshll.u32 (!%p135_p10), %s157_s16, 3 }
  0x10   : > { %s465_s20 = sshll.u32 (!%p135_p10), %s603_s12, 3  ;;  %s159_s26 = scalar_lea.vmem (!%p135_p10), [#allocation3], %s449_s18 }
  0x11   : > { %s366_s25 = scalar_lea.hbm (!%p135_p10), %s756_s2, %s465_s20  ;;  %s356_s29 = scalar_lea.sflag (!%p135_p10), [#allocation4], %s157_s16 }
  0x12   : > { %s370_s28 = sshll.u32 (!%p135_p10), %s366_s25, 4  ;;  %s553_s5 = scalar_lea.hbm (!%p135_p10), %s756_s2, 16  ;;  %s371_s28 = int_to_ptr.hbm [resolvable:$true] %s370_s28 }
  0x13   : > { %s547_s30 = sshra.s32 (!%p135_p10), %s371_s28, 4  ;;  %s548_s30 = int_to_ptr.hbm [resolvable:$true] %s547_s30 }
  0x14   : > { %s162_s23 = scalar_select %p161_p11, %s603_s12, 1  ;;  %vm202_vm0 = vcmask 1043456   ;;  %v177_v1 = vld [vmem:[%s755_s1] sm:$0xff]  ;;  %vm186_vm1 = vcmask 31744   ;;  %v178_v4 = vld [vmem:[%s755_s1 + $0x8] sm:$0xff]  ;;  %v179_v5 = vld [vmem:[%s755_s1 + $0x10] sm:$0xff] }
  0x15   : > { %v180_v6 = vld [vmem:[%s755_s1 + $0x18] sm:$0xff]  ;;  %v181_v7 = vld [vmem:[%s755_s1 + $0x20] sm:$0xff]  ;;  %vm174_vm2 = vcmask 261120   ;;  %v613_v52 = vmov 0.0   ;;  %s549_s12 = scalar_lea.hbm %s548_s30, 8  ;;  %p554_p1 = scmp.lt.s32.totalorder %s548_s30, %s756_s2 }
  0x16   : > { %s468_s24 = sshll.u32 %s162_s23, 3  ;;  %175 = vst.msk [vmem:[#allocation2] sm:$0xff] %vm174_vm2, %v613_v52  ;;  %p550_p12 = scmp.ne.s32.totalorder %s548_s30, %s549_s12 }
  0x17   : > { %s168_s27 = scalar_lea.vmem %s754_s0, %s468_s24  ;;  %p555_p2 = scmp.lt.s32.totalorder %s553_s5, %s549_s12 }
  0x18   : > { %v176_v0 = vld [vmem:[%s168_s27] sm:$0xff]  ;;  %s368_s27 = sshll.u32 %s159_s26, 4  ;;  %p551_p13 = pnand %p550_p12, %p669_p4  ;;  %s369_s27 = int_to_ptr.vmem [resolvable:$true] %s368_s27 }
  0x19   : > { %183 = vst [vmem:[#allocation1] ss:$2 sm:$0xff] %v176_v0  ;;  %p556_p3 = por %p555_p2, %p554_p1 }
  0x1a   : > { %p552_p0 = pneg %p551_p13 }
  0x1c   : > { %p557_p5 = pnand %p556_p3, %p552_p0 }
  0x1d   : > { %v305_v54 = vld [vmem:[#allocation2] sm:$0xff] }
  0x20   : > { %v184_v2 = vld.sshfl [vmem:[#allocation1] sm:$0xff pattern:$0x75316420]  ;;  %v185_v3 = vld.sshfl [vmem:[#allocation1 + $0x8] sm:$0xff pattern:$0x75316420] }
  0x21   : > { %452 = vmatpush.msk.msra.mxu0 %vm202_vm0, %v184_v2  ;;  %458 = vmatpush.msk.msra.mxu1 %vm202_vm0, %v185_v3 }
  0x22   : > { %453 = vmatmul.msk.f32.vlgmr.msra.gmra.mxu0 %vm186_vm1, %v177_v1  ;;  %459 = vmatmul.msk.f32.vlgmr.msra.gmra.mxu1 %vm186_vm1, %v177_v1 }
  0x2a   : > { %454 = vmatmul.msk.f32.gmra.mxu0 %vm186_vm1, %v178_v4  ;;  %460 = vmatmul.msk.f32.gmra.mxu1 %vm186_vm1, %v178_v4 }
  0x32   : > { %455 = vmatmul.msk.f32.gmra.mxu0 %vm186_vm1, %v179_v5  ;;  %461 = vmatmul.msk.f32.gmra.mxu1 %vm186_vm1, %v179_v5 }
  0x3a   : > { %456 = vmatmul.msk.f32.gmra.mxu0 %vm186_vm1, %v180_v6  ;;  %462 = vmatmul.msk.f32.gmra.mxu1 %vm186_vm1, %v180_v6 }
  0x42   : > { %457 = vmatmul.msk.f32.gmra.mxu0 %vm186_vm1, %v181_v7  ;;  %463 = vmatmul.msk.f32.gmra.mxu1 %vm186_vm1, %v181_v7 }
  0x9f   : > { %v224_v8 = vpop.f32.mrf.mxu0  ;;  %v256_v9 = vpop.f32.mrf.mxu1 }
  0xa7   : > { %v227_v10 = vpop.f32.mrf.mxu0  ;;  %v259_v11 = vpop.f32.mrf.mxu1 }
  0xaf   : > { %v230_v12 = vpop.f32.mrf.mxu0  ;;  %v262_v13 = vpop.f32.mrf.mxu1 }
  0xb7   : > { %v233_v14 = vpop.f32.mrf.mxu0  ;;  %v265_v15 = vpop.f32.mrf.mxu1 }
  0xb8   : > { %318 = vmatpush.xpose.msra.mxu2 %v233_v14  ;;  %338 = vmatpush.xpose.msra.mxu3 %v265_v15 }
  0xbc   : > { %319 = vmatpush.xpose.msra.mxu2 %v230_v12  ;;  %339 = vmatpush.xpose.msra.mxu3 %v262_v13 }
  0xbf   : > { %v236_v16 = vpop.f32.mrf.mxu0  ;;  %v268_v17 = vpop.f32.mrf.mxu1 }
  0xc0   : > { %v271_v18 = vrot.slane %v236_v16, 4  ;;  %v277_v19 = vrot.slane %v268_v17, 4  ;;  %320 = vmatpush.xpose.msra.mxu2 %v227_v10  ;;  %340 = vmatpush.xpose.msra.mxu3 %v259_v11 }
  0xc2   : > { %v272_v20 = vmax.f32 %v236_v16, %v271_v18  ;;  %v278_v21 = vmax.f32 %v268_v17, %v277_v19 }
  0xc4   : > { %v273_v22 = vrot.slane %v272_v20, 2  ;;  %v279_v23 = vrot.slane %v278_v21, 2  ;;  %321 = vmatpush.xpose.msra.mxu2 %v224_v8  ;;  %341 = vmatpush.xpose.msra.mxu3 %v256_v9 }
  0xc6   : > { %v274_v24 = vmax.f32 %v272_v20, %v273_v22  ;;  %v280_v25 = vmax.f32 %v278_v21, %v279_v23 }
  0xc8   : > { %v275_v26 = vrot.slane %v274_v24, 1  ;;  %v281_v27 = vrot.slane %v280_v25, 1 }
  0xca   : > { %v276_v28 = vmax.f32 %v274_v24, %v275_v26  ;;  %v282_v29 = vmax.f32 %v280_v25, %v281_v27 }
  0xcc   : > { %v283_v30 = vsub.f32 %v236_v16, %v276_v28  ;;  %v284_v31 = vsub.f32 %v268_v17, %v282_v29 }
  0xce   : > { %v285_v32 = vmul.f32 1.442695, %v283_v30  ;;  %v287_v33 = vmul.f32 1.442695, %v284_v31 }
  0xd0   : > { %525 = vpow2.f32 %v285_v32 }
  0xd1   : > { %527 = vpow2.f32 %v287_v33 }
  0xd6   : > { %v526_v34 = vpop.eup %525 }
  0xd7   : > { %v528_v35 = vpop.eup %527  ;;  %v289_v36 = vrot.slane %v526_v34, 4 }
  0xd8   : > { %v295_v37 = vrot.slane %v528_v35, 4 }
  0xd9   : > { %v290_v38 = vadd.f32 %v526_v34, %v289_v36 }
  0xda   : > { %v296_v39 = vadd.f32 %v528_v35, %v295_v37 }
  0xdb   : > { %v291_v40 = vrot.slane %v290_v38, 2 }
  0xdc   : > { %v297_v41 = vrot.slane %v296_v39, 2 }
  0xdd   : > { %v292_v42 = vadd.f32 %v291_v40, %v290_v38 }
  0xde   : > { %v298_v43 = vadd.f32 %v297_v41, %v296_v39 }
  0xdf   : > { %v293_v44 = vrot.slane %v292_v42, 1 }
  0xe0   : > { %v299_v45 = vrot.slane %v298_v43, 1 }
  0xe1   : > { %v294_v46 = vadd.f32 %v293_v44, %v292_v42 }
  0xe2   : > { %v300_v47 = vadd.f32 %v299_v45, %v298_v43 }
  0xe3   : > { %529 = vrcp.f32 %v294_v46 }
  0xe4   : > { %531 = vrcp.f32 %v300_v47 }
  0xe9   : > { %v530_v48 = vpop.eup %529 }
  0xea   : > { %v532_v49 = vpop.eup %531  ;;  %v303_v50 = vmul.f32 %v530_v48, %v526_v34 }
  0xeb   : > { %v304_v51 = vmul.f32 %v532_v49, %v528_v35 }
  0xec   : > { %322 = vmatmul.f32.vlgmr.msra.gmra.mxu2 %v303_v50 }
  0xed   : > { %342 = vmatmul.f32.vlgmr.msra.gmra.mxu3 %v304_v51 }
 0x16f   : > { %v323_v53 = vpop.f32.mrf.mxu2 }
 0x170   : > { %v343_v55 = vpop.f32.mrf.mxu3 }
 0x171   : > { %v344_v56 = vadd.f32 %v343_v55, %v323_v53 }
 0x173   : > { %v346_v57 = vadd.f32 %v344_v56, %v305_v54 }
 0x175   : > { %348 = vst.msk [vmem:[#allocation2] sm:$0xff] %vm174_vm2, %v346_v57 }
 0x17c   : > { %v352_v58 = vld [vmem:[#allocation2] sm:$0xff] }
 0x17d   : > { %v353_v59 = vmax.f32 %v352_v58, 0.0 }
 0x17f   : > { %354 = vst.msk [vmem:[%s159_s26] sm:$0xff] %vm174_vm2, %v353_v59 }
 0x180   : > { %560 = shalt.err (!%p557_p5)
}
 0x181   : > { %469 = dma.vmem_to_hbm [thread:$0]  (%p669_p4), %s369_s27, 128, %s371_s28, %s356_s29  }
 0x182 PF: > { %p475_p6 = scmp.ge.s32.totalorder %s611_s14, 2  ;;  %s382_s8 = sand.u32 1, %s591_s9  }
 0x183   : > { %s383_s15 = scalar_lea.sflag [#allocation4], %s382_s8 }
 0x184   : > { %p472_p7 = pnand %p475_p6, %p676_p8 }
 0x186   : > { %p473_p9 = pneg %p472_p7 }
 0x188   : > { %586 = dma.done.wait (%p473_p9), %s383_s15, 128  }
 0x189   : > { %588 = vsyncadd (%p473_p9), %s383_s15, 4294967168  ;;  %s15_s14 = sadd.s32 1, %s611_s14   ;;  %s759_s9 = smov %s595_s10 }
 0x18a   : > { %p12_p10 = scmp.ge.s32.totalorder %s15_s14, 4   ;;  %s760_s10 = smov %s599_s11 }
 0x18b   : > { %s761_s11 = smov %s682_s22  ;;  %s762_s12 = smov %s607_s13 }
 0x18c   : > { %s763_s13 = smov %s765_s17  ;;  %14 = sbr.rel (!%p12_p10) target bundleno = 4 (0x4), region = 71 }
 0x191   :  { %389 = vsyncpa [#allocation4], 1 }
 0x192   :  { %391 = vsyncpa [#allocation4 + $0x1], 1 }

</bundles_post_ra>
